<compile_context>
chip_gen: v7x
topology: tpu7x:2x2x1
jax: 0.10.0
libtpu: 0.0.40
codegen_flags: <defaults>
</compile_context>

<pallas_src>
import functools

import numpy as np
import jax
import jax.numpy as jnp
from jax import lax
from jax.experimental import pallas as pl
from jax.experimental.pallas import tpu as pltpu


# ---------------------------------------------------------------------------
# Fused sin/cos: one shared Cody-Waite range reduction + Cephes minimax
# polynomials.  TPU has no hardware sin/cos (EUP only does exp/recip/tanh/
# rsqrt), so jnp.sin and jnp.cos each expand to an independent VPU polynomial;
# sharing the reduction removes ~30-40% of that VALU work.
# Absolute error < ~2e-7 for |x| up to a few thousand (plenty here: |angle|
# <= 2*pi*(|gx|+|gy|)).
# ---------------------------------------------------------------------------
_TWO_OVER_PI = np.float32(0.6366197723675814)
# 3-part split of pi/2 (2x Cephes' pi/4 split); each part exactly
# representable in f32, so q*P_k stays exact for the |q| seen here.
_PIO2_1 = np.float32(1.5703125)
_PIO2_2 = np.float32(4.837512969970703125e-4)
_PIO2_3 = np.float32(7.5497899549e-8)
_S1 = np.float32(-1.6666654611e-1)
_S2 = np.float32(8.3321608736e-3)
_S3 = np.float32(-1.9515295891e-4)
_C1 = np.float32(4.166664568298827e-2)
_C2 = np.float32(-1.388731625493765e-3)
_C3 = np.float32(2.443315711809948e-5)


def _sincos_f32(x):
    """Returns (sin(x), cos(x)) with a single shared range reduction."""
    q = jnp.floor(x * _TWO_OVER_PI + np.float32(0.5))       # nearest quadrant
    r = ((x - q * _PIO2_1) - q * _PIO2_2) - q * _PIO2_3     # r in ~[-pi/4, pi/4]
    z = r * r
    sin_r = r + r * z * (_S1 + z * (_S2 + z * _S3))
    cos_r = np.float32(1.0) + z * (np.float32(-0.5)
                                   + z * (_C1 + z * (_C2 + z * _C3)))
    qi = q.astype(jnp.int32)                                 # two's complement
    swap = (qi & 1) == 1
    s = jnp.where(swap, cos_r, sin_r)
    c = jnp.where(swap, sin_r, cos_r)
    s = jnp.where((qi & 2) == 2, -s, s)
    c = jnp.where(((qi + 1) & 2) == 2, -c, c)
    return s, c


# ---------------------------------------------------------------------------
# Kernel 1: direct ("flat") evaluation, CHW-flat (2C, h*w) output.
# Used for small grids and grids whose width is not a multiple of 128.
# ---------------------------------------------------------------------------
def _pe_flat_kernel(g_ref, out_ref, *, h, w, tile_p, num_pos_feats):
    i = pl.program_id(0)

    # Linear pixel index of every lane in this block (f32; exact while
    # h*w < 2^23 -- asserted by the wrapper).  Do NOT replace the division by
    # an approximate reciprocal: the floor-based row/col derivation relies on
    # <= 1 ulp division error.
    p = lax.broadcasted_iota(jnp.int32, (1, tile_p), 1).astype(jnp.float32)
    p = p + (i * tile_p).astype(jnp.float32)

    wf = np.float32(w)
    hf = np.float32(h)
    row = jnp.floor((p + np.float32(0.5)) / wf)
    col = p - row * wf                                    # exact

    cx = np.float32(2.0) * ((col + np.float32(0.5)) / wf) - np.float32(1.0)
    cy = np.float32(2.0) * ((row + np.float32(0.5)) / hf) - np.float32(1.0)

    g = g_ref[...]                                        # (C, 2) = (2*pi*G).T
    gx = g[:, 0:1]                                        # (C, 1)
    gy = g[:, 1:2]                                        # (C, 1)

    # coords @ G as two rank-1 VPU updates (K=2 makes the MXU pointless);
    # 2*pi is already folded into g on the wrapper side.
    angle = gx * cx + gy * cy                             # (C, tile_p)

    s, co = _sincos_f32(angle)
    nf = num_pos_feats
    out_ref[0:nf, :] = s.astype(out_ref.dtype)
    out_ref[nf:2 * nf, :] = co.astype(out_ref.dtype)


# ---------------------------------------------------------------------------
# Kernel 2: separable table combine, (2C, h, w) output tiled (tile_h, tile_w).
# sin(ax+ay) = sin(ax)cos(ay) + cos(ax)sin(ay)
# cos(ax+ay) = cos(ax)cos(ay) - sin(ax)sin(ay)
# Tables arrive pre-shaped ((C,1,tile_w) and (C,tile_h,1)) so the kernel is
# pure loads + broadcast mul/add + lane-dense stores (no relayout, no XLU).
# ---------------------------------------------------------------------------
def _pe_separable_kernel(sax_ref, cax_ref, say_ref, cay_ref, out_ref, *,
                         num_pos_feats):
    nf = num_pos_feats
    sax = sax_ref[...]          # (C, 1, tile_w)
    cax = cax_ref[...]          # (C, 1, tile_w)
    say = say_ref[...]          # (C, tile_h, 1)
    cay = cay_ref[...]          # (C, tile_h, 1)
    out_ref[0:nf, :, :] = (sax * cay + cax * say).astype(out_ref.dtype)
    out_ref[nf:2 * nf, :, :] = (cax * cay - sax * say).astype(out_ref.dtype)


# ---------------------------------------------------------------------------
# Wrapper
# ---------------------------------------------------------------------------
def _round_up(x, m):
    return ((x + m - 1) // m) * m


def _largest_divisor(n, cap, multiple):
    """Largest d <= cap with n % d == 0 and d % multiple == 0 (None if none)."""
    best = None
    top = min(n, cap)
    for d in range(multiple, top + 1, multiple):
        if n % d == 0:
            best = d
    return best


def position_embedding_random_forward(gaussian_matrix, size, *,
                                      out_dtype=jnp.float32,
                                      block_bytes=4 * 1024 * 1024):
    """Equivalent of PositionEmbeddingRandom.forward(size).

    Args:
      gaussian_matrix: (2, num_pos_feats) float32 buffer.
      size: (h, w) grid size.
      out_dtype: float32 matches the module; bfloat16 halves HBM writeback
        (recommended for v5e consumers that tolerate it).
      block_bytes: target output-block size.  4 MiB default is compile-safe on
        every generation; v5e/v6e callers may raise to 8-16 MiB, v7x <= 8 MiB.
    Returns:
      (2 * num_pos_feats, h, w) positional encoding.
    """
    h, w = int(size[0]), int(size[1])
    two, c = gaussian_matrix.shape
    assert two == 2
    c2 = 2 * c
    itemsize = jnp.dtype(out_dtype).itemsize
    assert itemsize in (2, 4), "out_dtype must be a 16- or 32-bit float"
    sub = 8 * (4 // itemsize)          # sublane tile: 8 (f32) / 16 (bf16)
    assert c % sub == 0, (
        f"num_pos_feats={c} must be a multiple of {sub} so the sin/cos halves "
        f"stay sublane-tile aligned for {jnp.dtype(out_dtype).name} output")
    p_total = h * w

    # Fold the 2*pi scale into the tiny (2, C) matrix once (wrapper-side).
    g = jnp.asarray(gaussian_matrix, jnp.float32) * np.float32(2.0 * np.pi)

    vmem_limit = int(min(100 << 20, max(40 << 20, 5 * block_bytes)))

    use_separable = (w % 128 == 0) and (h % sub == 0)

    if use_separable:
        # ---- separable path: per-column / per-row sin-cos tables ----------
        tile_w = _largest_divisor(w, 512, 128)
        tile_h_cap = max(sub, (block_bytes // itemsize) // (c2 * tile_w))
        tile_h = _largest_divisor(h, tile_h_cap, sub)
        # Make sure mid/large grids produce >= 2 blocks (v7x has 2 TensorCores).
        if (h // tile_h) * (w // tile_w) == 1 and p_total > 1024:
            d = _largest_divisor(h, tile_h // 2, sub)
            if d is not None:
                tile_h = d
            else:
                d = _largest_divisor(w, tile_w // 2, 128)
                if d is not None:
                    tile_w = d

        # Tables (tiny: C*(h+w) elements) computed once in plain JAX, shaped
        # so the kernel can use them without any in-kernel reshape.
        ys = (jnp.arange(h, dtype=jnp.float32) + np.float32(0.5)) / np.float32(h)
        xs = (jnp.arange(w, dtype=jnp.float32) + np.float32(0.5)) / np.float32(w)
        cy = np.float32(2.0) * ys - np.float32(1.0)            # (h,)
        cx = np.float32(2.0) * xs - np.float32(1.0)            # (w,)
        ax = g[0][:, None] * cx[None, :]                       # (C, w)
        ay = g[1][:, None] * cy[None, :]                       # (C, h)
        sax = jnp.sin(ax)[:, None, :]                          # (C, 1, w)
        cax = jnp.cos(ax)[:, None, :]                          # (C, 1, w)
        say = jnp.sin(ay)[:, :, None]                          # (C, h, 1)
        cay = jnp.cos(ay)[:, :, None]                          # (C, h, 1)

        xspec = pl.BlockSpec((c, 1, tile_w), lambda i, j: (0, 0, j))
        yspec = pl.BlockSpec((c, tile_h, 1), lambda i, j: (0, i, 0))

        out = pl.pallas_call(
            functools.partial(_pe_separable_kernel, num_pos_feats=c),
            out_shape=jax.ShapeDtypeStruct((c2, h, w), out_dtype),
            grid=(h // tile_h, w // tile_w),
            in_specs=[xspec, xspec, yspec, yspec],
            out_specs=pl.BlockSpec((c2, tile_h, tile_w),
                                   lambda i, j: (0, i, j)),
            compiler_params=pltpu.CompilerParams(
                dimension_semantics=("parallel", "parallel"),
                vmem_limit_bytes=vmem_limit),
        )(sax, cax, say, cay)
        return out

    # ---- flat path: direct evaluation over the flattened pixel axis -------
    assert p_total < (1 << 23), "in-kernel f32 index math requires h*w < 2^23"

    target_p = max(128, ((block_bytes // (c2 * itemsize)) // 128) * 128)
    if p_total > target_p:
        tile_p = target_p
    elif p_total > 1024:
        # >= 2 grid steps so both v7x TensorCores get work.
        tile_p = min(target_p, _round_up(-(-p_total // 2), 128))
    else:
        tile_p = p_total
    grid = (pl.cdiv(p_total, tile_p),)

    # Tiny one-time transpose so the feature axis lands on sublanes and column
    # slices broadcast directly against (1, tile_p).
    g_t = g.T                                                   # (C, 2)

    out_flat = pl.pallas_call(
        functools.partial(_pe_flat_kernel, h=h, w=w, tile_p=tile_p,
                          num_pos_feats=c),
        out_shape=jax.ShapeDtypeStruct((c2, p_total), out_dtype),
        grid=grid,
        in_specs=[
            # Tiny (C, 2) matrix, resident in VMEM (constant index_map).
            pl.BlockSpec((c, 2), lambda i: (0, 0)),
        ],
        out_specs=pl.BlockSpec((c2, tile_p), lambda i: (0, i)),
        compiler_params=pltpu.CompilerParams(
            dimension_semantics=("parallel",),
            vmem_limit_bytes=vmem_limit),
    )(g_t)

    # Free row-major reshape (no data movement) -> matches pe.permute(2, 0, 1).
    return out_flat.reshape(c2, h, w)


# ---------------------------------------------------------------------------
# Pure-JAX reference (mirror of the PyTorch module).
# ---------------------------------------------------------------------------
def _reference_forward(gaussian_matrix, size):
    h, w = size
    grid = jnp.ones((h, w), dtype=jnp.float32)
    y_embed = (jnp.cumsum(grid, axis=0) - 0.5) / h
    x_embed = (jnp.cumsum(grid, axis=1) - 0.5) / w
    cx = 2.0 * x_embed - 1.0
    cy = 2.0 * y_embed - 1.0
    # coords @ G written as rank-1 updates so the reference stays pure f32.
    proj = cx[..., None] * gaussian_matrix[0] + cy[..., None] * gaussian_matrix[1]
    proj = 2.0 * np.pi * proj
    pe = jnp.concatenate([jnp.sin(proj), jnp.cos(proj)], axis=-1)
    return jnp.transpose(pe, (2, 0, 1))


if __name__ == "__main__":
    num_pos_feats = 64
    scale = 1.0

    key = jax.random.PRNGKey(0)
    gaussian_matrix = scale * jax.random.normal(
        key, (2, num_pos_feats), dtype=jnp.float32)

    cases = [
        (16, 16),    # flat path, single block (module-typical small size)
        (24, 40),    # flat path, odd extents (non-128 lane width)
        (48, 64),    # flat path, 2 grid steps (two-TC split)
        (64, 128),   # separable path, grid (2, 1)
        (64, 768),   # separable path, 2-D grid (4, 2)
    ]
    for (h, w) in cases:
        pe = jax.block_until_ready(
            position_embedding_random_forward(gaussian_matrix, (h, w)))
        ref = jax.block_until_ready(_reference_forward(gaussian_matrix, (h, w)))
        assert pe.shape == (2 * num_pos_feats, h, w), (pe.shape, (h, w))
        assert pe.dtype == jnp.float32
        np.testing.assert_allclose(np.asarray(pe), np.asarray(ref),
                                   rtol=1e-5, atol=1e-5)

    print("KERNEL_OK")
</pallas_src>

<mosaic_0001>
module attributes {stable_mosaic.version = 11 : i64} {
  func.func @_pe_flat_kernel(%arg0: i32, %arg1: memref<64x2xf32, #tpu.memory_space<vmem>>, %arg2: memref<128x256xf32, #tpu.memory_space<vmem>>) attributes {dimension_semantics = [#tpu.dimension_semantics<parallel>], iteration_bounds = array<i64: 1>, scalar_prefetch = 0 : i64, scratch_operands = 0 : i64, tpu.core_type = #tpu.core_type<tc>, window_params = [{pipeline_mode = #tpu.pipeline_mode<synchronous>, transform_indices = @transform_0, window_bounds = array<i64: 64, 2>}, {transform_indices = @transform_1, window_bounds = array<i64: 128, 256>}]} {
    %0 = tpu.iota {dimensions = array<i32: 1>} : vector<1x256xi32>
    %1 = arith.sitofp %0 : vector<1x256xi32> to vector<1x256xf32>
    %c256_i32 = arith.constant 256 : i32
    %2 = arith.muli %arg0, %c256_i32 : i32
    %3 = arith.sitofp %2 : i32 to f32
    %4 = vector.broadcast %3 : f32 to vector<1x256xf32>
    %5 = arith.addf %1, %4 : vector<1x256xf32>
    %cst = arith.constant 5.000000e-01 : f32
    %6 = vector.broadcast %cst : f32 to vector<1x256xf32>
    %7 = arith.addf %5, %6 : vector<1x256xf32>
    %cst_0 = arith.constant 1.600000e+01 : f32
    %8 = vector.broadcast %cst_0 : f32 to vector<1x256xf32>
    %9 = arith.divf %7, %8 : vector<1x256xf32>
    %10 = math.floor %9 : vector<1x256xf32>
    %cst_1 = arith.constant 1.600000e+01 : f32
    %11 = vector.broadcast %cst_1 : f32 to vector<1x256xf32>
    %12 = arith.mulf %10, %11 : vector<1x256xf32>
    %13 = arith.subf %5, %12 : vector<1x256xf32>
    %cst_2 = arith.constant 5.000000e-01 : f32
    %14 = vector.broadcast %cst_2 : f32 to vector<1x256xf32>
    %15 = arith.addf %13, %14 : vector<1x256xf32>
    %cst_3 = arith.constant 1.600000e+01 : f32
    %16 = vector.broadcast %cst_3 : f32 to vector<1x256xf32>
    %17 = arith.divf %15, %16 : vector<1x256xf32>
    %cst_4 = arith.constant 2.000000e+00 : f32
    %18 = vector.broadcast %cst_4 : f32 to vector<1x256xf32>
    %19 = arith.mulf %18, %17 : vector<1x256xf32>
    %cst_5 = arith.constant 1.000000e+00 : f32
    %20 = vector.broadcast %cst_5 : f32 to vector<1x256xf32>
    %21 = arith.subf %19, %20 : vector<1x256xf32>
    %cst_6 = arith.constant 5.000000e-01 : f32
    %22 = vector.broadcast %cst_6 : f32 to vector<1x256xf32>
    %23 = arith.addf %10, %22 : vector<1x256xf32>
    %cst_7 = arith.constant 1.600000e+01 : f32
    %24 = vector.broadcast %cst_7 : f32 to vector<1x256xf32>
    %25 = arith.divf %23, %24 : vector<1x256xf32>
    %cst_8 = arith.constant 2.000000e+00 : f32
    %26 = vector.broadcast %cst_8 : f32 to vector<1x256xf32>
    %27 = arith.mulf %26, %25 : vector<1x256xf32>
    %cst_9 = arith.constant 1.000000e+00 : f32
    %28 = vector.broadcast %cst_9 : f32 to vector<1x256xf32>
    %29 = arith.subf %27, %28 : vector<1x256xf32>
    %c0 = arith.constant 0 : index
    %c0_10 = arith.constant 0 : index
    %30 = vector.load %arg1[%c0, %c0_10] : memref<64x2xf32, #tpu.memory_space<vmem>>, vector<64x2xf32>
    %31 = vector.extract_strided_slice %30 {offsets = [0, 0], sizes = [64, 1], strides = [1, 1]} : vector<64x2xf32> to vector<64x1xf32>
    %32 = vector.extract_strided_slice %30 {offsets = [0, 1], sizes = [64, 1], strides = [1, 1]} : vector<64x2xf32> to vector<64x1xf32>
    %33 = vector.broadcast %31 : vector<64x1xf32> to vector<64x256xf32>
    %34 = vector.broadcast %21 : vector<1x256xf32> to vector<64x256xf32>
    %35 = arith.mulf %33, %34 : vector<64x256xf32>
    %36 = vector.broadcast %32 : vector<64x1xf32> to vector<64x256xf32>
    %37 = vector.broadcast %29 : vector<1x256xf32> to vector<64x256xf32>
    %38 = arith.mulf %36, %37 : vector<64x256xf32>
    %39 = arith.addf %35, %38 : vector<64x256xf32>
    %cst_11 = arith.constant 0.636619746 : f32
    %40 = vector.broadcast %cst_11 : f32 to vector<64x256xf32>
    %41 = arith.mulf %39, %40 : vector<64x256xf32>
    %cst_12 = arith.constant 5.000000e-01 : f32
    %42 = vector.broadcast %cst_12 : f32 to vector<64x256xf32>
    %43 = arith.addf %41, %42 : vector<64x256xf32>
    %44 = math.floor %43 : vector<64x256xf32>
    %cst_13 = arith.constant 1.5703125 : f32
    %45 = vector.broadcast %cst_13 : f32 to vector<64x256xf32>
    %46 = arith.mulf %44, %45 : vector<64x256xf32>
    %47 = arith.subf %39, %46 : vector<64x256xf32>
    %cst_14 = arith.constant 4.83751297E-4 : f32
    %48 = vector.broadcast %cst_14 : f32 to vector<64x256xf32>
    %49 = arith.mulf %44, %48 : vector<64x256xf32>
    %50 = arith.subf %47, %49 : vector<64x256xf32>
    %cst_15 = arith.constant 7.549790e-08 : f32
    %51 = vector.broadcast %cst_15 : f32 to vector<64x256xf32>
    %52 = arith.mulf %44, %51 : vector<64x256xf32>
    %53 = arith.subf %50, %52 : vector<64x256xf32>
    %54 = arith.mulf %53, %53 : vector<64x256xf32>
    %55 = arith.mulf %53, %54 : vector<64x256xf32>
    %cst_16 = arith.constant -1.95152956E-4 : f32
    %56 = vector.broadcast %cst_16 : f32 to vector<64x256xf32>
    %57 = arith.mulf %54, %56 : vector<64x256xf32>
    %cst_17 = arith.constant 0.00833216123 : f32
    %58 = vector.broadcast %cst_17 : f32 to vector<64x256xf32>
    %59 = arith.addf %58, %57 : vector<64x256xf32>
    %60 = arith.mulf %54, %59 : vector<64x256xf32>
    %cst_18 = arith.constant -0.166666552 : f32
    %61 = vector.broadcast %cst_18 : f32 to vector<64x256xf32>
    %62 = arith.addf %61, %60 : vector<64x256xf32>
    %63 = arith.mulf %55, %62 : vector<64x256xf32>
    %64 = arith.addf %53, %63 : vector<64x256xf32>
    %cst_19 = arith.constant 2.44331568E-5 : f32
    %65 = vector.broadcast %cst_19 : f32 to vector<64x256xf32>
    %66 = arith.mulf %54, %65 : vector<64x256xf32>
    %cst_20 = arith.constant -0.00138873165 : f32
    %67 = vector.broadcast %cst_20 : f32 to vector<64x256xf32>
    %68 = arith.addf %67, %66 : vector<64x256xf32>
    %69 = arith.mulf %54, %68 : vector<64x256xf32>
    %cst_21 = arith.constant 0.0416666456 : f32
    %70 = vector.broadcast %cst_21 : f32 to vector<64x256xf32>
    %71 = arith.addf %70, %69 : vector<64x256xf32>
    %72 = arith.mulf %54, %71 : vector<64x256xf32>
    %cst_22 = arith.constant -5.000000e-01 : f32
    %73 = vector.broadcast %cst_22 : f32 to vector<64x256xf32>
    %74 = arith.addf %73, %72 : vector<64x256xf32>
    %75 = arith.mulf %54, %74 : vector<64x256xf32>
    %cst_23 = arith.constant 1.000000e+00 : f32
    %76 = vector.broadcast %cst_23 : f32 to vector<64x256xf32>
    %77 = arith.addf %76, %75 : vector<64x256xf32>
    %78 = arith.fptosi %44 : vector<64x256xf32> to vector<64x256xi32>
    %c1_i32 = arith.constant 1 : i32
    %79 = vector.broadcast %c1_i32 : i32 to vector<64x256xi32>
    %80 = arith.andi %78, %79 : vector<64x256xi32>
    %c1_i32_24 = arith.constant 1 : i32
    %81 = vector.broadcast %c1_i32_24 : i32 to vector<64x256xi32>
    %82 = arith.cmpi eq, %80, %81 : vector<64x256xi32>
    %83 = arith.select %82, %77, %64 : vector<64x256xi1>, vector<64x256xf32>
    %84 = arith.select %82, %64, %77 : vector<64x256xi1>, vector<64x256xf32>
    %c2_i32 = arith.constant 2 : i32
    %85 = vector.broadcast %c2_i32 : i32 to vector<64x256xi32>
    %86 = arith.andi %78, %85 : vector<64x256xi32>
    %c2_i32_25 = arith.constant 2 : i32
    %87 = vector.broadcast %c2_i32_25 : i32 to vector<64x256xi32>
    %88 = arith.cmpi eq, %86, %87 : vector<64x256xi32>
    %cst_26 = arith.constant 0.000000e+00 : f32
    %89 = vector.broadcast %cst_26 : f32 to vector<64x256xf32>
    %90 = arith.subf %89, %83 : vector<64x256xf32>
    %91 = arith.select %88, %90, %83 : vector<64x256xi1>, vector<64x256xf32>
    %c1_i32_27 = arith.constant 1 : i32
    %92 = vector.broadcast %c1_i32_27 : i32 to vector<64x256xi32>
    %93 = arith.addi %78, %92 : vector<64x256xi32>
    %c2_i32_28 = arith.constant 2 : i32
    %94 = vector.broadcast %c2_i32_28 : i32 to vector<64x256xi32>
    %95 = arith.andi %93, %94 : vector<64x256xi32>
    %c2_i32_29 = arith.constant 2 : i32
    %96 = vector.broadcast %c2_i32_29 : i32 to vector<64x256xi32>
    %97 = arith.cmpi eq, %95, %96 : vector<64x256xi32>
    %cst_30 = arith.constant 0.000000e+00 : f32
    %98 = vector.broadcast %cst_30 : f32 to vector<64x256xf32>
    %99 = arith.subf %98, %84 : vector<64x256xf32>
    %100 = arith.select %97, %99, %84 : vector<64x256xi1>, vector<64x256xf32>
    %c0_31 = arith.constant 0 : index
    %c0_32 = arith.constant 0 : index
    %101 = vector.load %arg2[%c0_31, %c0_32] : memref<128x256xf32, #tpu.memory_space<vmem>>, vector<64x256xf32>
    tpu.vector_store %arg2[%c0_31, %c0_32], %91 {strides = array<i32>} : memref<128x256xf32, #tpu.memory_space<vmem>>, vector<64x256xf32>,
    %c64 = arith.constant 64 : index
    %c0_33 = arith.constant 0 : index
    %102 = vector.load %arg2[%c64, %c0_33] : memref<128x256xf32, #tpu.memory_space<vmem>>, vector<64x256xf32>
    tpu.vector_store %arg2[%c64, %c0_33], %100 {strides = array<i32>} : memref<128x256xf32, #tpu.memory_space<vmem>>, vector<64x256xf32>,
    return
  }
  func.func @transform_0(%arg0: i32) -> (i32, i32) {
    %c0_i32 = arith.constant 0 : i32
    %c0_i32_0 = arith.constant 0 : i32
    %c0_i32_1 = arith.constant 0 : i32
    return %c0_i32, %c0_i32_0 : i32, i32
  }
  func.func @transform_1(%arg0: i32) -> (i32, i32) {
    %c0_i32 = arith.constant 0 : i32
    %c0_i32_0 = arith.constant 0 : i32
    return %c0_i32, %arg0 : i32, i32
  }
}

</mosaic_0001>

<bundles_post_ra>
// kernel: tpu_custom_call.1
= control target key start
LH: loop header
LB: loop body
LE: loop exit
PB: predicated region body
PF: predicated region fallthrough
CT: control target
= control target key end

     0   :  { %v915_v2 = vmov 0   ;;  %s1555_s0 = inlined_call_operand.vmem [shape: f32[64,2], index: 0, kind: input, shape index: {}]   ;;  %s1556_s1 = inlined_call_operand.hbm [shape: f32[128,256], index: 1, kind: output, shape index: {}]  }
   0x1   :  { %v48_v0 = vld [vmem:[%s1555_s0 + $0x10] sm:$0xff]  ;;  %v46_v1 = vld [vmem:[%s1555_s0] sm:$0xff]  ;;  %888 = vset.pattern.permute.xlu1 %v915_v2  ;;  %887 = vset.pattern.permute.xlu0 %v915_v2 }
   0x2   :  { %66 = vperm.xlu1 %888, %v48_v0   ;;  %56 = vperm.xlu0 %887, %v46_v1  }
   0x3   :  { %6 = vsyncpa [#allocation3], 0  ;;  %v49_v3 = vld [vmem:[%s1555_s0 + $0x18] sm:$0xff]  ;;  %v47_v4 = vld [vmem:[%s1555_s0 + $0x8] sm:$0xff]  ;;  %v916_v9 = vmov 1   ;;  %v9_v10 = vlaneseq }
   0x4   :  { %v51_v5 = vld [vmem:[%s1555_s0 + $0x28] sm:$0xff]  ;;  %v50_v6 = vld [vmem:[%s1555_s0 + $0x20] sm:$0xff]  ;;  %v53_v7 = vld [vmem:[%s1555_s0 + $0x38] sm:$0xff] }
   0x5   :  { %v52_v8 = vld [vmem:[%s1555_s0 + $0x30] sm:$0xff]  ;;  %v10_v11 = vand.u32 127, %v9_v10  ;;  %s917_s0 = smov [#allocation2]  }
   0x6   :  { %71 = vperm.xlu1 %888, %v49_v3   ;;  %61 = vperm.xlu0 %887, %v47_v4   ;;  %s835_s22 = sshll.u32 %s917_s0, 4  ;;  %s836_s22 = int_to_ptr.vmem [resolvable:$true] %s835_s22 }
   0x7   :  { %v11_v12 = vadd.s32 128, %v10_v11  ;;  %v12_v13 = vcvt.s32.f32 %v10_v11  ;;  %s891_s23 = scalar_lea.vmem %s836_s22, 4096  ;;  %p896_p1 = scmp.lt.s32.totalorder %s836_s22, %s836_s22 }
   0x8   :  { %p892_p0 = scmp.ne.s32.totalorder %s836_s22, %s891_s23  ;;  %p897_p2 = scmp.lt.s32.totalorder %s891_s23, %s891_s23 }
   0x9   :  { %v13_v14 = vcvt.s32.f32 %v11_v12  ;;  %v19_v15 = vadd.f32 0.5, %v12_v13 }
   0xa   :  { %81 = vperm.xlu1 %888, %v51_v5   ;;  %76 = vperm.xlu0 %887, %v50_v6   ;;  %p898_p3 = por %p897_p2, %p896_p1 }
   0xb   :  { %v20_v16 = vadd.f32 0.5, %v13_v14  ;;  %v22_v17 = vmul.f32 0.0625, %v19_v15 }
   0xc   :  { %p899_p4 = pnand %p898_p3, %p892_p0 }
   0xd   :  { %v23_v18 = vmul.f32 0.0625, %v20_v16  ;;  %v24_v19 = vfloor.f32 %v22_v17 }
   0xe   :  { %91 = vperm.xlu1 %888, %v53_v7   ;;  %86 = vperm.xlu0 %887, %v52_v8  }
   0xf   :  { %v25_v20 = vfloor.f32 %v23_v18  ;;  %v26_v21 = vmul.f32 16.0, %v24_v19  ;;  %v38_v31 = vadd.f32 0.5, %v24_v19 }
  0x11   :  { %v27_v22 = vmul.f32 16.0, %v25_v20  ;;  %v28_v23 = vsub.f32 %v12_v13, %v26_v21  ;;  %v39_v32 = vadd.f32 0.5, %v25_v20  ;;  %v40_v37 = vmul.f32 0.0625, %v38_v31 }
  0x12   :  { %890 = vset.pattern.permute.xlu1 %v916_v9  ;;  %889 = vset.pattern.permute.xlu0 %v916_v9 }
  0x13   :  { %115 = vperm.xlu1 %890, %v47_v4   ;;  %111 = vperm.xlu0 %889, %v46_v1   ;;  %v29_v24 = vsub.f32 %v13_v14, %v27_v22  ;;  %v30_v25 = vadd.f32 0.5, %v28_v23  ;;  %v41_v38 = vmul.f32 0.0625, %v39_v32  ;;  %v42_v47 = vmul.f32 2.0, %v40_v37 }
  0x15   :  { %v31_v26 = vadd.f32 0.5, %v29_v24  ;;  %v32_v27 = vmul.f32 0.0625, %v30_v25  ;;  %v43_v48 = vmul.f32 2.0, %v41_v38  ;;  %v970_v55 = vadd.f32 -1.0, %v42_v47 }
  0x17   :  { %119 = vperm.xlu1 %890, %v48_v0   ;;  %123 = vperm.xlu0 %889, %v49_v3   ;;  %v33_v28 = vmul.f32 0.0625, %v31_v26  ;;  %v34_v33 = vmul.f32 2.0, %v32_v27  ;;  %v972_v56 = vadd.f32 -1.0, %v43_v48 }
  0x19   :  { %v35_v34 = vmul.f32 2.0, %v33_v28  ;;  %v846_v39 = vadd.f32 -1.0, %v34_v33 }
  0x1b   :  { %127 = vperm.xlu1 %890, %v50_v6   ;;  %131 = vperm.xlu0 %889, %v51_v5   ;;  %v847_v40 = vadd.f32 -1.0, %v35_v34 }
  0x1f   :  { %135 = vperm.xlu1 %890, %v52_v8   ;;  %139 = vperm.xlu0 %889, %v53_v7  }
  0x81   :  { %v67_v29 = vpop.permute.xlu1 %66  ;;  %v57_v30 = vpop.permute.xlu0 %56 }
  0x82   :  { %v94_v57 = vmul.f32 %v846_v39, %v57_v30  ;;  %v95_v58 = vmul.f32 %v847_v40, %v57_v30  ;;  %v98_v20 = vmul.f32 %v846_v39, %v67_v29  ;;  %v99_v21 = vmul.f32 %v847_v40, %v67_v29 }
  0x85   :  { %v72_v35 = vpop.permute.xlu1 %71  ;;  %v62_v36 = vpop.permute.xlu0 %61 }
  0x86   :  { %v96_v59 = vmul.f32 %v846_v39, %v62_v36  ;;  %v97_v60 = vmul.f32 %v847_v40, %v62_v36  ;;  %v100_v22 = vmul.f32 %v846_v39, %v72_v35  ;;  %v101_v24 = vmul.f32 %v847_v40, %v72_v35 }
  0x89   :  { %v82_v41 = vpop.permute.xlu1 %81  ;;  %v77_v42 = vpop.permute.xlu0 %76 }
  0x8a   :  { %v954_v43 = vmul.f32 %v846_v39, %v82_v41  ;;  %v956_v44 = vmul.f32 %v847_v40, %v82_v41  ;;  %v958_v45 = vmul.f32 %v846_v39, %v77_v42  ;;  %v960_v46 = vmul.f32 %v847_v40, %v77_v42 }
  0x8d   :  { %v92_v49 = vpop.permute.xlu1 %91  ;;  %v87_v50 = vpop.permute.xlu0 %86 }
  0x8e   :  { %v962_v51 = vmul.f32 %v846_v39, %v92_v49  ;;  %v964_v52 = vmul.f32 %v847_v40, %v92_v49  ;;  %v966_v53 = vmul.f32 %v846_v39, %v87_v50  ;;  %v968_v54 = vmul.f32 %v847_v40, %v87_v50 }
  0x92   :  { %v116_v61 = vpop.permute.xlu1 %115  ;;  %v112_v62 = vpop.permute.xlu0 %111 }
  0x93   :  { %v144_v63 = vmul.f32 %v970_v55, %v116_v61  ;;  %v145_v0 = vmul.f32 %v972_v56, %v116_v61  ;;  %v142_v1 = vmul.f32 %v970_v55, %v112_v62  ;;  %v143_v2 = vmul.f32 %v972_v56, %v112_v62 }
  0x95   :  { %v160_v3 = vadd.f32 %v144_v63, %v96_v59  ;;  %v161_v4 = vadd.f32 %v145_v0, %v97_v60  ;;  %v158_v5 = vadd.f32 %v142_v1, %v94_v57  ;;  %v159_v6 = vadd.f32 %v143_v2, %v95_v58 }
  0x96   :  { %v120_v7 = vpop.permute.xlu1 %119  ;;  %v124_v8 = vpop.permute.xlu0 %123 }
  0x97   :  { %v176_v9 = vmul.f32 0.63661975, %v160_v3  ;;  %v177_v10 = vmul.f32 0.63661975, %v161_v4  ;;  %v174_v11 = vmul.f32 0.63661975, %v158_v5  ;;  %v146_v13 = vmul.f32 %v970_v55, %v120_v7 }
  0x98   :  { %v175_v12 = vmul.f32 0.63661975, %v159_v6  ;;  %v147_v14 = vmul.f32 %v972_v56, %v120_v7  ;;  %v148_v15 = vmul.f32 %v970_v55, %v124_v8  ;;  %v149_v19 = vmul.f32 %v972_v56, %v124_v8 }
  0x99   :  { %v192_v16 = vadd.f32 0.5, %v176_v9  ;;  %v193_v17 = vadd.f32 0.5, %v177_v10  ;;  %v190_v18 = vadd.f32 0.5, %v174_v11  ;;  %v986_v30 = vadd.f32 %v146_v13, %v98_v20 }
  0x9a   :  { %v191_v23 = vadd.f32 0.5, %v175_v12  ;;  %v988_v31 = vadd.f32 %v147_v14, %v99_v21  ;;  %v990_v34 = vadd.f32 %v148_v15, %v100_v22  ;;  %v992_v36 = vadd.f32 %v149_v19, %v101_v24 }
  0x9b   :  { %v208_v25 = vfloor.f32 %v192_v16  ;;  %v209_v26 = vfloor.f32 %v193_v17  ;;  %v982_v27 = vfloor.f32 %v190_v18  ;;  %v1001_v61 = vmul.f32 0.63661975, %v986_v30 }
  0x9c   :  { %v984_v28 = vfloor.f32 %v191_v23  ;;  %v1004_v62 = vmul.f32 0.63661975, %v988_v31  ;;  %v1011_v1 = vmul.f32 0.63661975, %v990_v34  ;;  %v1014_v2 = vmul.f32 0.63661975, %v992_v36 }
  0x9d   :  { %v224_v32 = vmul.f32 1.5703125, %v208_v25  ;;  %v225_v33 = vmul.f32 1.5703125, %v209_v26  ;;  %v256_v29 = vmul.f32 0.0004837513, %v208_v25  ;;  %v257_v37 = vmul.f32 0.0004837513, %v209_v26 }
  0x9e   :  { %v854_v38 = vtrunc.f32 %v208_v25  ;;  %v856_v35 = vtrunc.f32 %v209_v26  ;;  %v222_v41 = vmul.f32 1.5703125, %v982_v27  ;;  %v223_v42 = vmul.f32 1.5703125, %v984_v28 }
  0x9f   :  { %v240_v39 = vsub.f32 %v160_v3, %v224_v32  ;;  %v241_v40 = vsub.f32 %v161_v4, %v225_v33  ;;  %v288_v47 = vmul.f32 7.54979e-08, %v208_v25  ;;  %v289_v57 = vmul.f32 7.54979e-08, %v209_v26 }
  0xa0   :  { %v996_v48 = vcvt.f32.s32 %v854_v38  ;;  %v998_v58 = vcvt.f32.s32 %v856_v35  ;;  %v238_v59 = vsub.f32 %v158_v5, %v222_v41  ;;  %v239_v60 = vsub.f32 %v159_v6, %v223_v42 }
  0xa1   :  { %v272_v49 = vsub.f32 %v240_v39, %v256_v29  ;;  %v273_v50 = vsub.f32 %v241_v40, %v257_v37  ;;  %v254_v5 = vmul.f32 0.0004837513, %v982_v27  ;;  %v255_v6 = vmul.f32 0.0004837513, %v984_v28 }
  0xa2   :  { %v592_v3 = vand.u32 1, %v996_v48  ;;  %v720_v4 = vadd.s32 1, %v996_v48  ;;  %v593_v9 = vand.u32 1, %v998_v58  ;;  %v656_v10 = vand.u32 2, %v996_v48 }
  0xa3   :  { %v1006_v63 = vsub.f32 %v272_v49, %v288_v47  ;;  %v1008_v0 = vsub.f32 %v273_v50, %v289_v57  ;;  %v657_v11 = vand.u32 2, %v998_v58  ;;  %v270_v12 = vsub.f32 %v238_v59, %v254_v5 }
  0xa4   :  { %v271_v13 = vsub.f32 %v239_v60, %v255_v6  ;;  %v286_v14 = vmul.f32 7.54979e-08, %v982_v27  ;;  %v287_v17 = vmul.f32 7.54979e-08, %v984_v28  ;;  %v721_v20 = vadd.s32 1, %v998_v58 }
  0xa5   :  { %v1022_v7 = vmul.f32 %v1006_v63, %v1006_v63  ;;  %v1026_v8 = vmul.f32 %v1008_v0, %v1008_v0  ;;  %v736_v21 = vand.u32 2, %v720_v4  ;;  %v850_v33 = vtrunc.f32 %v982_v27 }
  0xa6   :  { %v1038_v24 = vsub.f32 %v270_v12, %v286_v14  ;;  %v1040_v25 = vsub.f32 %v271_v13, %v287_v17  ;;  %v852_v29 = vtrunc.f32 %v984_v28  ;;  %v737_v28 = vand.u32 2, %v721_v20 }
  0xa7   :  { %v352_v15 = vmul.f32 -0.00019515296, %v1022_v7  ;;  %v353_v16 = vmul.f32 -0.00019515296, %v1026_v8  ;;  %v448_v18 = vmul.f32 2.4433157e-05, %v1022_v7  ;;  %v336_v40 = vmul.f32 %v1022_v7, %v1006_v63 }
  0xa8   :  { %v449_v19 = vmul.f32 2.4433157e-05, %v1026_v8  ;;  %v1048_v35 = vmul.f32 %v1038_v24, %v1038_v24  ;;  %v1052_v39 = vmul.f32 %v1040_v25, %v1040_v25  ;;  %v337_v42 = vmul.f32 %v1026_v8, %v1008_v0 }
  0xa9   :  { %v368_v22 = vadd.f32 0.008332161, %v352_v15  ;;  %v369_v23 = vadd.f32 0.008332161, %v353_v16  ;;  %v464_v26 = vadd.f32 -0.0013887316, %v448_v18  ;;  %v1060_v49 = vcvt.f32.s32 %v850_v33 }
  0xaa   :  { %v465_v32 = vadd.f32 -0.0013887316, %v449_v19  ;;  %v350_v58 = vmul.f32 -0.00019515296, %v1048_v35  ;;  %v1063_v59 = vcvt.f32.s32 %v852_v29  ;;  %vm1065_vm0 = vcmp.eq.s32.totalorder %v592_v3, 1 }
  0xab   :  { %v384_v37 = vmul.f32 %v368_v22, %v1022_v7  ;;  %v385_v38 = vmul.f32 %v369_v23, %v1026_v8  ;;  %v480_v41 = vmul.f32 %v464_v26, %v1022_v7  ;;  %vm1069_vm1 = vcmp.eq.s32.totalorder %v593_v9, 1 }
  0xac   :  { %v481_v27 = vmul.f32 %v465_v32, %v1026_v8  ;;  %v334_v6 = vmul.f32 %v1048_v35, %v1038_v24  ;;  %v351_v12 = vmul.f32 -0.00019515296, %v1052_v39  ;;  %v446_v13 = vmul.f32 2.4433157e-05, %v1048_v35 }
  0xad   :  { %v400_v47 = vadd.f32 -0.16666655, %v384_v37  ;;  %v401_v48 = vadd.f32 -0.16666655, %v385_v38  ;;  %v496_v50 = vadd.f32 0.041666646, %v480_v41  ;;  %v335_v9 = vmul.f32 %v1052_v39, %v1040_v25 }
  0xae   :  { %v497_v57 = vadd.f32 0.041666646, %v481_v27  ;;  %v366_v16 = vadd.f32 0.008332161, %v350_v58  ;;  %v447_v3 = vmul.f32 2.4433157e-05, %v1052_v39 }
  0xaf   :  { %v416_v60 = vmul.f32 %v400_v47, %v336_v40  ;;  %v512_v14 = vmul.f32 %v496_v50, %v1022_v7  ;;  %v417_v17 = vmul.f32 %v401_v48, %v337_v42  ;;  %v367_v18 = vadd.f32 0.008332161, %v351_v12 }
  0xb0   :  { %v513_v15 = vmul.f32 %v497_v57, %v1026_v8  ;;  %v462_v19 = vadd.f32 -0.0013887316, %v446_v13  ;;  %vm1082_vm2 = vcmp.eq.s32.totalorder %v656_v10, 2  ;;  %vm1086_vm3 = vcmp.eq.s32.totalorder %v657_v11, 2 }
  0xb1   :  { %v528_v20 = vadd.f32 -0.5, %v512_v14  ;;  %vm1090_vm4 = vcmp.eq.s32.totalorder %v736_v21, 2  ;;  %vm1094_vm5 = vcmp.eq.s32.totalorder %v737_v28, 2  ;;  %v382_v29 = vmul.f32 %v366_v16, %v1048_v35 }
  0xb2   :  { %v529_v22 = vadd.f32 -0.5, %v513_v15  ;;  %v463_v37 = vadd.f32 -0.0013887316, %v447_v3  ;;  %v432_v10 = vadd.f32 %v416_v60, %v1006_v63  ;;  %v383_v38 = vmul.f32 %v367_v18, %v1052_v39 }
  0xb3   :  { %v478_v11 = vmul.f32 %v462_v19, %v1048_v35  ;;  %v590_v40 = vand.u32 1, %v1060_v49  ;;  %v544_v21 = vmul.f32 %v528_v20, %v1022_v7  ;;  %v398_v27 = vadd.f32 -0.16666655, %v382_v29 }
  0xb4   :  { %v545_v41 = vmul.f32 %v529_v22, %v1026_v8  ;;  %v479_v28 = vmul.f32 %v463_v37, %v1052_v39  ;;  %v433_v42 = vadd.f32 %v417_v17, %v1008_v0  ;;  %v399_v47 = vadd.f32 -0.16666655, %v383_v38 }
  0xb5   :  { %v494_v48 = vadd.f32 0.041666646, %v478_v11  ;;  %v591_v50 = vand.u32 1, %v1063_v59  ;;  %v560_v63 = vadd.f32 1.0, %v544_v21  ;;  %v414_v58 = vmul.f32 %v398_v27, %v334_v6 }
  0xb6   :  { %v561_v57 = vadd.f32 1.0, %v545_v41  ;;  %v495_v60 = vadd.f32 0.041666646, %v479_v28  ;;  %v415_v12 = vmul.f32 %v399_v47, %v335_v9  ;;  %vm1109_vm6 = vcmp.eq.s32.totalorder %v590_v40, 1 }
  0xb7   :  { %v510_v13 = vmul.f32 %v494_v48, %v1048_v35  ;;  %v654_v8 = vand.u32 2, %v1060_v49  ;;  %v655_v14 = vand.u32 2, %v1063_v59  ;;  %v624_v0 = vsel %vm1065_vm0, %v560_v63, %v432_v10 }
  0xb8   :  { %v625_v15 = vsel %vm1069_vm1, %v561_v57, %v433_v42  ;;  %v640_v6 = vsel %vm1065_vm0, %v432_v10, %v560_v63  ;;  %v641_v16 = vsel %vm1069_vm1, %v433_v42, %v561_v57  ;;  %v688_v3 = vsub.f32 0.0, %v624_v0 }
  0xb9   :  { %v689_v17 = vsub.f32 0.0, %v625_v15  ;;  %v768_v9 = vsub.f32 0.0, %v640_v6  ;;  %v769_v18 = vsub.f32 0.0, %v641_v16  ;;  %vm1123_vm7 = vcmp.eq.s32.totalorder %v591_v50, 1 }
  0xba   :  { %v430_v20 = vadd.f32 %v414_v58, %v1038_v24  ;;  %v431_v22 = vadd.f32 %v415_v12, %v1040_v25  ;;  %v511_v29 = vmul.f32 %v495_v60, %v1052_v39  ;;  %v526_v37 = vadd.f32 -0.5, %v510_v13 }
  0xbb   :  { %v704_v4 = vsel %vm1082_vm2, %v688_v3, %v624_v0  ;;  %v705_v5 = vsel %vm1086_vm3, %v689_v17, %v625_v15  ;;  %v784_v10 = vsel %vm1090_vm4, %v768_v9, %v640_v6  ;;  %v785_v38 = vsel %vm1094_vm5, %v769_v18, %v641_v16 }
  0xbc   :  { %800 = vst [vmem:[#allocation2 + $0x10] sm:$0xff] %v704_v4  ;;  %801 = vst [vmem:[#allocation2 + $0x18] sm:$0xff] %v705_v5  ;;  %v527_v24 = vadd.f32 -0.5, %v511_v29  ;;  %v542_v25 = vmul.f32 %v526_v37, %v1048_v35  ;;  %vm1139_vm8 = vcmp.eq.s32.totalorder %v654_v8, 2  ;;  %vm1143_vm9 = vcmp.eq.s32.totalorder %v655_v14, 2 }
  0xbd   :  { %816 = vst [vmem:[#allocation2 + $0x90] sm:$0xff] %v784_v10  ;;  %817 = vst [vmem:[#allocation2 + $0x98] sm:$0xff] %v785_v38  ;;  %v718_v26 = vadd.s32 1, %v1060_v49  ;;  %v719_v32 = vadd.s32 1, %v1063_v59  ;;  %v194_v33 = vadd.f32 0.5, %v1001_v61  ;;  %v195_v40 = vadd.f32 0.5, %v1004_v62 }
  0xbe   :  { %v543_v21 = vmul.f32 %v527_v24, %v1052_v39  ;;  %v558_v41 = vadd.f32 1.0, %v542_v25  ;;  %v196_v35 = vadd.f32 0.5, %v1011_v1  ;;  %v197_v27 = vadd.f32 0.5, %v1014_v2 }
  0xbf   :  { %v734_v28 = vand.u32 2, %v718_v26  ;;  %v735_v42 = vand.u32 2, %v719_v32  ;;  %v210_v47 = vfloor.f32 %v194_v33  ;;  %v211_v48 = vfloor.f32 %v195_v40 }
  0xc0   :  { %v559_v50 = vadd.f32 1.0, %v543_v21  ;;  %v622_v49 = vsel %vm1109_vm6, %v558_v41, %v430_v20  ;;  %v638_v61 = vsel %vm1109_vm6, %v430_v20, %v558_v41  ;;  %v1158_v59 = vfloor.f32 %v196_v35 }
  0xc1   :  { %v686_v62 = vsub.f32 0.0, %v622_v49  ;;  %vm750_vm10 = vcmp.eq.s32.totalorder %v734_v28, 2  ;;  %vm1160_vm11 = vcmp.eq.s32.totalorder %v735_v42, 2  ;;  %v766_v1 = vsub.f32 0.0, %v638_v61 }
  0xc2   :  { %v623_v2 = vsel %vm1123_vm7, %v559_v50, %v431_v22  ;;  %v639_v63 = vsel %vm1123_vm7, %v431_v22, %v559_v50  ;;  %v226_v57 = vmul.f32 1.5703125, %v210_v47  ;;  %v227_v58 = vmul.f32 1.5703125, %v211_v48 }
  0xc3   :  { %v687_v60 = vsub.f32 0.0, %v623_v2  ;;  %v702_v12 = vsel %vm1139_vm8, %v686_v62, %v622_v49  ;;  %v767_v13 = vsub.f32 0.0, %v639_v63  ;;  %v782_v7 = vsel %vm750_vm10, %v766_v1, %v638_v61 }
  0xc4   :  { %798 = vst [vmem:[#allocation2] sm:$0xff] %v702_v12  ;;  %814 = vst [vmem:[#allocation2 + $0x80] sm:$0xff] %v782_v7  ;;  %v242_v8 = vsub.f32 %v986_v30, %v226_v57  ;;  %v243_v14 = vsub.f32 %v988_v31, %v227_v58  ;;  %v258_v0 = vmul.f32 0.0004837513, %v210_v47  ;;  %v259_v15 = vmul.f32 0.0004837513, %v211_v48 }
  0xc5   :  { %v703_v6 = vsel %vm1143_vm9, %v687_v60, %v623_v2  ;;  %v783_v16 = vsel %vm1160_vm11, %v767_v13, %v639_v63  ;;  %v290_v3 = vmul.f32 7.54979e-08, %v210_v47  ;;  %v291_v17 = vmul.f32 7.54979e-08, %v211_v48 }
  0xc6   :  { %799 = vst [vmem:[#allocation2 + $0x8] sm:$0xff] %v703_v6  ;;  %815 = vst [vmem:[#allocation2 + $0x88] sm:$0xff] %v783_v16  ;;  %v274_v9 = vsub.f32 %v242_v8, %v258_v0  ;;  %v275_v18 = vsub.f32 %v243_v14, %v259_v15  ;;  %v858_v19 = vtrunc.f32 %v210_v47  ;;  %v860_v20 = vtrunc.f32 %v211_v48  ;;  %v1207_v0 = vpop.permute.xlu1 %127 }
  0xc7   :  { %v213_v22 = vfloor.f32 %v197_v27  ;;  %v228_v30 = vmul.f32 1.5703125, %v1158_v59  ;;  %v260_v38 = vmul.f32 0.0004837513, %v1158_v59  ;;  %v292_v24 = vmul.f32 7.54979e-08, %v1158_v59 }
  0xc8   :  { %v1177_v31 = vsub.f32 %v274_v9, %v290_v3  ;;  %v1179_v29 = vsub.f32 %v275_v18, %v291_v17  ;;  %v859_v37 = vcvt.f32.s32 %v858_v19  ;;  %v861_v4 = vcvt.f32.s32 %v860_v20 }
  0xc9   :  { %v229_v25 = vmul.f32 1.5703125, %v213_v22  ;;  %v244_v11 = vsub.f32 %v990_v34, %v228_v30  ;;  %v261_v23 = vmul.f32 0.0004837513, %v213_v22  ;;  %v293_v26 = vmul.f32 7.54979e-08, %v213_v22 }
  0xca   :  { %v1183_v5 = vmul.f32 %v1177_v31, %v1177_v31  ;;  %v1187_v10 = vmul.f32 %v1179_v29, %v1179_v29  ;;  %v594_v40 = vand.u32 1, %v859_v37  ;;  %v595_v21 = vand.u32 1, %v861_v4 }
  0xcb   :  { %v722_v27 = vadd.s32 1, %v859_v37  ;;  %v723_v28 = vadd.s32 1, %v861_v4  ;;  %v658_v48 = vand.u32 2, %v859_v37  ;;  %v659_v50 = vand.u32 2, %v861_v4 }
  0xcc   :  { %v354_v32 = vmul.f32 -0.00019515296, %v1183_v5  ;;  %v355_v33 = vmul.f32 -0.00019515296, %v1187_v10  ;;  %v450_v41 = vmul.f32 2.4433157e-05, %v1183_v5  ;;  %v338_v34 = vmul.f32 %v1183_v5, %v1177_v31 }
  0xcd   :  { %v451_v35 = vmul.f32 2.4433157e-05, %v1187_v10  ;;  %v339_v49 = vmul.f32 %v1187_v10, %v1179_v29  ;;  %v245_v2 = vsub.f32 %v992_v36, %v229_v25  ;;  %v276_v63 = vsub.f32 %v244_v11, %v260_v38 }
  0xce   :  { %v370_v42 = vadd.f32 0.008332161, %v354_v32  ;;  %v371_v47 = vadd.f32 0.008332161, %v355_v33  ;;  %v466_v61 = vadd.f32 -0.0013887316, %v450_v41  ;;  %v862_v16 = vtrunc.f32 %v1158_v59 }
  0xcf   :  { %v467_v62 = vadd.f32 -0.0013887316, %v451_v35  ;;  %v738_v60 = vand.u32 2, %v722_v27  ;;  %v739_v12 = vand.u32 2, %v723_v28  ;;  %v277_v8 = vsub.f32 %v245_v2, %v261_v23 }
  0xd0   :  { %v386_v39 = vmul.f32 %v370_v42, %v1183_v5  ;;  %v387_v1 = vmul.f32 %v371_v47, %v1187_v10  ;;  %v482_v57 = vmul.f32 %v466_v61, %v1183_v5  ;;  %v1205_v14 = vsub.f32 %v276_v63, %v292_v24 }
  0xd1   :  { %v483_v58 = vmul.f32 %v467_v62, %v1187_v10  ;;  %v864_v3 = vtrunc.f32 %v213_v22  ;;  %v1210_v9 = vsub.f32 %v277_v8, %v293_v26  ;;  %vm1218_vm12 = vcmp.eq.s32.totalorder %v594_v40, 1 }
  0xd2   :  { %v402_v13 = vadd.f32 -0.16666655, %v386_v39  ;;  %v403_v7 = vadd.f32 -0.16666655, %v387_v1  ;;  %v498_v15 = vadd.f32 0.041666646, %v482_v57  ;;  %v1214_v18 = vmul.f32 %v1205_v14, %v1205_v14 }
  0xd3   :  { %v499_v6 = vadd.f32 0.041666646, %v483_v58  ;;  %v1224_v59 = vmul.f32 %v970_v55, %v1207_v0  ;;  %vm1226_vm13 = vcmp.eq.s32.totalorder %v595_v21, 1  ;;  %v1232_v37 = vmul.f32 %v1210_v9, %v1210_v9 }
  0xd4   :  { %v418_v36 = vmul.f32 %v402_v13, %v338_v34  ;;  %v419_v17 = vmul.f32 %v403_v7, %v339_v49  ;;  %v514_v19 = vmul.f32 %v498_v15, %v1183_v5  ;;  %v1234_v4 = vcvt.f32.s32 %v862_v16 }
  0xd5   :  { %v515_v20 = vmul.f32 %v499_v6, %v1187_v10  ;;  %v1236_v38 = vcvt.f32.s32 %v864_v3  ;;  %vm1238_vm14 = vcmp.eq.s32.totalorder %v658_v48, 2  ;;  %vm1242_vm15 = vcmp.eq.s32.totalorder %v659_v50, 2 }
  0xd6   :  { %v530_v24 = vadd.f32 -0.5, %v514_v19  ;;  %vm1246_vm0 = vcmp.eq.s32.totalorder %v738_v60, 2  ;;  %vm1250_vm1 = vcmp.eq.s32.totalorder %v739_v12, 2  ;;  %v356_v33 = vmul.f32 -0.00019515296, %v1214_v18 }
  0xd7   :  { %v531_v25 = vadd.f32 -0.5, %v515_v20  ;;  %v452_v40 = vmul.f32 2.4433157e-05, %v1214_v18  ;;  %v434_v21 = vadd.f32 %v418_v36, %v1177_v31  ;;  %v435_v41 = vadd.f32 %v419_v17, %v1179_v29 }
  0xd8   :  { %v357_v35 = vmul.f32 -0.00019515296, %v1232_v37  ;;  %v453_v27 = vmul.f32 2.4433157e-05, %v1232_v37  ;;  %v546_v28 = vmul.f32 %v530_v24, %v1183_v5  ;;  %v372_v47 = vadd.f32 0.008332161, %v356_v33 }
  0xd9   :  { %v547_v42 = vmul.f32 %v531_v25, %v1187_v10  ;;  %v468_v48 = vadd.f32 -0.0013887316, %v452_v40  ;;  %v340_v50 = vmul.f32 %v1214_v18, %v1205_v14  ;;  %v596_v61 = vand.u32 1, %v1234_v4  ;;  %v132_v40 = vpop.permute.xlu0 %131 }
  0xda   :  { %v373_v34 = vadd.f32 0.008332161, %v357_v35  ;;  %v469_v49 = vadd.f32 -0.0013887316, %v453_v27  ;;  %v562_v31 = vadd.f32 1.0, %v546_v28  ;;  %v388_v29 = vmul.f32 %v372_v47, %v1214_v18 }
  0xdb   :  { %v563_v62 = vadd.f32 1.0, %v547_v42  ;;  %v484_v39 = vmul.f32 %v468_v48, %v1214_v18  ;;  %v597_v10 = vand.u32 1, %v1236_v38  ;;  %v660_v2 = vand.u32 2, %v1234_v4 }
  0xdc   :  { %v389_v1 = vmul.f32 %v373_v34, %v1232_v37  ;;  %v485_v5 = vmul.f32 %v469_v49, %v1232_v37  ;;  %v626_v63 = vsel %vm1218_vm12, %v562_v31, %v434_v21  ;;  %v642_v58 = vsel %vm1218_vm12, %v434_v21, %v562_v31 }
  0xdd   :  { %v627_v57 = vsel %vm1226_vm13, %v563_v62, %v435_v41  ;;  %v643_v60 = vsel %vm1226_vm13, %v435_v41, %v563_v62  ;;  %v690_v12 = vsub.f32 0.0, %v626_v63  ;;  %v770_v7 = vsub.f32 0.0, %v642_v58 }
  0xde   :  { %v691_v13 = vsub.f32 0.0, %v627_v57  ;;  %v771_v8 = vsub.f32 0.0, %v643_v60  ;;  %v341_v15 = vmul.f32 %v1232_v37, %v1210_v9  ;;  %v404_v6 = vadd.f32 -0.16666655, %v388_v29 }
  0xdf   :  { %v405_v16 = vadd.f32 -0.16666655, %v389_v1  ;;  %v500_v3 = vadd.f32 0.041666646, %v484_v39  ;;  %v706_v36 = vsel %vm1238_vm14, %v690_v12, %v626_v63  ;;  %v786_v19 = vsel %vm1246_vm0, %v770_v7, %v642_v58 }
  0xe0   :  { %v707_v17 = vsel %vm1242_vm15, %v691_v13, %v627_v57  ;;  %v787_v20 = vsel %vm1250_vm1, %v771_v8, %v643_v60  ;;  %vm1289_vm2 = vcmp.eq.s32.totalorder %v596_v61, 1  ;;  %802 = vst [vmem:[#allocation2 + $0x20] sm:$0xff] %v706_v36  ;;  %818 = vst [vmem:[#allocation2 + $0xa0] sm:$0xff] %v786_v19  ;;  %v420_v22 = vmul.f32 %v404_v6, %v340_v50  ;;  %v136_v57 = vpop.permute.xlu1 %135 }
  0xe1   :  { %803 = vst [vmem:[#allocation2 + $0x28] sm:$0xff] %v707_v17  ;;  %819 = vst [vmem:[#allocation2 + $0xa8] sm:$0xff] %v787_v20  ;;  %v501_v24 = vadd.f32 0.041666646, %v485_v5  ;;  %v516_v25 = vmul.f32 %v500_v3, %v1214_v18  ;;  %v151_v11 = vmul.f32 %v972_v56, %v1207_v0  ;;  %v421_v23 = vmul.f32 %v405_v16, %v341_v15 }
  0xe2   :  { %v661_v26 = vand.u32 2, %v1236_v38  ;;  %v724_v32 = vadd.s32 1, %v1234_v4  ;;  %v725_v33 = vadd.s32 1, %v1236_v38  ;;  %vm1300_vm3 = vcmp.eq.s32.totalorder %v597_v10, 1 }
  0xe3   :  { %v517_v21 = vmul.f32 %v501_v24, %v1232_v37  ;;  %v532_v41 = vadd.f32 -0.5, %v516_v25  ;;  %vm1304_vm4 = vcmp.eq.s32.totalorder %v660_v2, 2  ;;  %v436_v0 = vadd.f32 %v420_v22, %v1205_v14 }
  0xe4   :  { %v740_v28 = vand.u32 2, %v724_v32  ;;  %v741_v42 = vand.u32 2, %v725_v33  ;;  %v166_v4 = vadd.f32 %v1224_v59, %v958_v45  ;;  %v167_v48 = vadd.f32 %v151_v11, %v960_v46 }
  0xe5   :  { %v533_v38 = vadd.f32 -0.5, %v517_v21  ;;  %v548_v47 = vmul.f32 %v532_v41, %v1214_v18  ;;  %v152_v50 = vmul.f32 %v970_v55, %v132_v40  ;;  %v437_v34 = vadd.f32 %v421_v23, %v1210_v9 }
  0xe6   :  { %vm1315_vm5 = vcmp.eq.s32.totalorder %v661_v26, 2  ;;  %v182_v61 = vmul.f32 0.63661975, %v166_v4  ;;  %v153_v14 = vmul.f32 %v972_v56, %v132_v40  ;;  %v183_v45 = vmul.f32 0.63661975, %v167_v48 }
  0xe7   :  { %v549_v31 = vmul.f32 %v533_v38, %v1232_v37  ;;  %v564_v62 = vadd.f32 1.0, %v548_v47  ;;  %v1322_v59 = vadd.f32 %v152_v50, %v954_v43  ;;  %vm1324_vm6 = vcmp.eq.s32.totalorder %v740_v28, 2 }
  0xe8   :  { %vm1328_vm7 = vcmp.eq.s32.totalorder %v741_v42, 2  ;;  %v198_v18 = vadd.f32 0.5, %v182_v61  ;;  %v1333_v29 = vadd.f32 %v153_v14, %v956_v44  ;;  %v199_v1 = vadd.f32 0.5, %v183_v45 }
  0xe9   :  { %v565_v39 = vadd.f32 1.0, %v549_v31  ;;  %v628_v37 = vsel %vm1289_vm2, %v564_v62, %v436_v0  ;;  %v644_v43 = vsel %vm1289_vm2, %v436_v0, %v564_v62  ;;  %v184_v63 = vmul.f32 0.63661975, %v1322_v59 }
  0xea   :  { %v692_v5 = vsub.f32 0.0, %v628_v37  ;;  %v772_v10 = vsub.f32 0.0, %v644_v43  ;;  %v214_v2 = vfloor.f32 %v198_v18  ;;  %v215_v60 = vfloor.f32 %v199_v1 }
  0xeb   :  { %v629_v58 = vsel %vm1300_vm3, %v565_v39, %v437_v34  ;;  %v645_v44 = vsel %vm1300_vm3, %v437_v34, %v565_v39  ;;  %v185_v12 = vmul.f32 0.63661975, %v1333_v29  ;;  %v154_v3 = vmul.f32 %v970_v55, %v136_v57 }
  0xec   :  { %v693_v13 = vsub.f32 0.0, %v629_v58  ;;  %v708_v7 = vsel %vm1304_vm4, %v692_v5, %v628_v37  ;;  %v773_v8 = vsub.f32 0.0, %v645_v44  ;;  %v788_v15 = vsel %vm1324_vm6, %v772_v10, %v644_v43 }
  0xed   :  { %804 = vst [vmem:[#allocation2 + $0x30] sm:$0xff] %v708_v7  ;;  %820 = vst [vmem:[#allocation2 + $0xb0] sm:$0xff] %v788_v15  ;;  %v230_v6 = vmul.f32 1.5703125, %v214_v2  ;;  %v231_v16 = vmul.f32 1.5703125, %v215_v60  ;;  %v155_v36 = vmul.f32 %v972_v56, %v136_v57  ;;  %v262_v20 = vmul.f32 0.0004837513, %v214_v2 }
  0xee   :  { %v709_v17 = vsel %vm1315_vm5, %v693_v13, %v629_v58  ;;  %v789_v19 = vsel %vm1328_vm7, %v773_v8, %v645_v44  ;;  %v263_v30 = vmul.f32 0.0004837513, %v215_v60  ;;  %v866_v25 = vtrunc.f32 %v214_v2 }
  0xef   :  { %805 = vst [vmem:[#allocation2 + $0x38] sm:$0xff] %v709_v17  ;;  %821 = vst [vmem:[#allocation2 + $0xb8] sm:$0xff] %v789_v19  ;;  %v246_v22 = vsub.f32 %v166_v4, %v230_v6  ;;  %v247_v24 = vsub.f32 %v167_v48, %v231_v16  ;;  %v868_v11 = vtrunc.f32 %v215_v60  ;;  %v294_v23 = vmul.f32 7.54979e-08, %v214_v2 }
  0xf0   :  { %v295_v26 = vmul.f32 7.54979e-08, %v215_v60  ;;  %v200_v32 = vadd.f32 0.5, %v184_v63  ;;  %v201_v33 = vadd.f32 0.5, %v185_v12  ;;  %v867_v41 = vcvt.f32.s32 %v866_v25 }
  0xf1   :  { %v278_v40 = vsub.f32 %v246_v22, %v262_v20  ;;  %v279_v21 = vsub.f32 %v247_v24, %v263_v30  ;;  %v869_v35 = vcvt.f32.s32 %v868_v11  ;;  %v1356_v27 = vadd.f32 %v154_v3, %v966_v53 }
  0xf2   :  { %v1359_v0 = vadd.f32 %v155_v36, %v968_v54  ;;  %v726_v4 = vadd.s32 1, %v867_v41  ;;  %v216_v50 = vfloor.f32 %v200_v32  ;;  %v217_v34 = vfloor.f32 %v201_v33 }
  0xf3   :  { %v1361_v28 = vsub.f32 %v278_v40, %v294_v23  ;;  %v1363_v42 = vsub.f32 %v279_v21, %v295_v26  ;;  %v727_v38 = vadd.s32 1, %v869_v35  ;;  %v598_v49 = vand.u32 1, %v867_v41 }
  0xf4   :  { %v599_v53 = vand.u32 1, %v869_v35  ;;  %v1370_v61 = vmul.f32 0.63661975, %v1356_v27  ;;  %v1373_v54 = vmul.f32 0.63661975, %v1359_v0  ;;  %v662_v62 = vand.u32 2, %v867_v41 }
  0xf5   :  { %v326_v47 = vmul.f32 %v1361_v28, %v1361_v28  ;;  %v327_v48 = vmul.f32 %v1363_v42, %v1363_v42  ;;  %v663_v45 = vand.u32 2, %v869_v35  ;;  %v742_v18 = vand.u32 2, %v726_v4 }
  0xf6   :  { %v743_v39 = vand.u32 2, %v727_v38  ;;  %v232_v1 = vmul.f32 1.5703125, %v216_v50  ;;  %v233_v5 = vmul.f32 1.5703125, %v217_v34  ;;  %v264_v63 = vmul.f32 0.0004837513, %v216_v50 }
  0xf7   :  { %v358_v14 = vmul.f32 -0.00019515296, %v326_v47  ;;  %v359_v31 = vmul.f32 -0.00019515296, %v327_v48  ;;  %v454_v46 = vmul.f32 2.4433157e-05, %v326_v47  ;;  %v342_v17 = vmul.f32 %v326_v47, %v1361_v28 }
  0xf8   :  { %v455_v9 = vmul.f32 2.4433157e-05, %v327_v48  ;;  %v265_v57 = vmul.f32 0.0004837513, %v217_v34  ;;  %v248_v60 = vsub.f32 %v1322_v59, %v232_v1  ;;  %v249_v12 = vsub.f32 %v1333_v29, %v233_v5 }
  0xf9   :  { %v374_v37 = vadd.f32 0.008332161, %v358_v14  ;;  %v375_v43 = vadd.f32 0.008332161, %v359_v31  ;;  %v470_v10 = vadd.f32 -0.0013887316, %v454_v46  ;;  %v343_v19 = vmul.f32 %v327_v48, %v1363_v42 }
  0xfa   :  { %v471_v2 = vadd.f32 -0.0013887316, %v455_v9  ;;  %v296_v8 = vmul.f32 7.54979e-08, %v216_v50  ;;  %v297_v15 = vmul.f32 7.54979e-08, %v217_v34  ;;  %v280_v3 = vsub.f32 %v248_v60, %v264_v63 }
  0xfb   :  { %v390_v58 = vmul.f32 %v374_v37, %v326_v47  ;;  %v391_v44 = vmul.f32 %v375_v43, %v327_v48  ;;  %v486_v13 = vmul.f32 %v470_v10, %v326_v47  ;;  %v281_v36 = vsub.f32 %v249_v12, %v265_v57 }
  0xfc   :  { %v487_v7 = vmul.f32 %v471_v2, %v327_v48  ;;  %v1379_v22 = vsub.f32 %v280_v3, %v296_v8  ;;  %v870_v59 = vtrunc.f32 %v216_v50  ;;  %v872_v29 = vtrunc.f32 %v217_v34 }
  0xfd   :  { %v406_v6 = vadd.f32 -0.16666655, %v390_v58  ;;  %v407_v16 = vadd.f32 -0.16666655, %v391_v44  ;;  %v502_v20 = vadd.f32 0.041666646, %v486_v13  ;;  %v1381_v24 = vsub.f32 %v281_v36, %v297_v15 }
  0xfe   :  { %v503_v30 = vadd.f32 0.041666646, %v487_v7  ;;  %vm1383_vm8 = vcmp.eq.s32.totalorder %v598_v49, 1  ;;  %vm1387_vm9 = vcmp.eq.s32.totalorder %v599_v53, 1  ;;  %v1393_v40 = vmul.f32 %v1379_v22, %v1379_v22 }
  0xff   :  { %v518_v25 = vmul.f32 %v502_v20, %v326_v47  ;;  %v422_v32 = vmul.f32 %v406_v6, %v342_v17  ;;  %v423_v33 = vmul.f32 %v407_v16, %v343_v19  ;;  %v1397_v21 = vmul.f32 %v1381_v24, %v1381_v24 }
 0x100   :  { %v519_v11 = vmul.f32 %v503_v30, %v327_v48  ;;  %vm1399_vm10 = vcmp.eq.s32.totalorder %v662_v62, 2  ;;  %vm1403_vm11 = vcmp.eq.s32.totalorder %v663_v45, 2  ;;  %vm1407_vm12 = vcmp.eq.s32.totalorder %v742_v18, 2 }
 0x101   :  { %v534_v41 = vadd.f32 -0.5, %v518_v25  ;;  %vm1411_vm13 = vcmp.eq.s32.totalorder %v743_v39, 2  ;;  %v360_v49 = vmul.f32 -0.00019515296, %v1393_v40  ;;  %v361_v53 = vmul.f32 -0.00019515296, %v1397_v21 }
 0x102   :  { %v535_v35 = vadd.f32 -0.5, %v519_v11  ;;  %v871_v14 = vcvt.f32.s32 %v870_v59  ;;  %v873_v31 = vcvt.f32.s32 %v872_v29  ;;  %v456_v45 = vmul.f32 2.4433157e-05, %v1393_v40 }
 0x103   :  { %v550_v62 = vmul.f32 %v534_v41, %v326_v47  ;;  %v457_v9 = vmul.f32 2.4433157e-05, %v1397_v21  ;;  %v438_v18 = vadd.f32 %v422_v32, %v1361_v28  ;;  %v439_v37 = vadd.f32 %v423_v33, %v1363_v42 }
 0x104   :  { %v551_v46 = vmul.f32 %v535_v35, %v327_v48  ;;  %v376_v39 = vadd.f32 0.008332161, %v360_v49  ;;  %v377_v43 = vadd.f32 0.008332161, %v361_v53  ;;  %v472_v10 = vadd.f32 -0.0013887316, %v456_v45 }
 0x105   :  { %v566_v1 = vadd.f32 1.0, %v550_v62  ;;  %v473_v2 = vadd.f32 -0.0013887316, %v457_v9  ;;  %v600_v47 = vand.u32 1, %v871_v14  ;;  %v601_v48 = vand.u32 1, %v873_v31  ;;  %v140_v62 = vpop.permute.xlu0 %139 }
 0x106   :  { %v567_v5 = vadd.f32 1.0, %v551_v46  ;;  %v392_v63 = vmul.f32 %v376_v39, %v1393_v40  ;;  %v393_v57 = vmul.f32 %v377_v43, %v1397_v21  ;;  %v488_v6 = vmul.f32 %v472_v10, %v1393_v40 }
 0x107   :  { %v630_v58 = vsel %vm1383_vm8, %v566_v1, %v438_v18  ;;  %v646_v42 = vsel %vm1383_vm8, %v438_v18, %v566_v1  ;;  %v489_v16 = vmul.f32 %v473_v2, %v1397_v21  ;;  %v344_v20 = vmul.f32 %v1393_v40, %v1379_v22 }
 0x108   :  { %v631_v28 = vsel %vm1387_vm9, %v567_v5, %v439_v37  ;;  %v647_v44 = vsel %vm1387_vm9, %v439_v37, %v567_v5  ;;  %v694_v60 = vsub.f32 0.0, %v630_v58  ;;  %v774_v13 = vsub.f32 0.0, %v646_v42 }
 0x109   :  { %v695_v12 = vsub.f32 0.0, %v631_v28  ;;  %v775_v7 = vsub.f32 0.0, %v647_v44  ;;  %v408_v8 = vadd.f32 -0.16666655, %v392_v63  ;;  %v409_v15 = vadd.f32 -0.16666655, %v393_v57 }
 0x10a   :  { %v710_v3 = vsel %vm1399_vm10, %v694_v60, %v630_v58  ;;  %v790_v17 = vsel %vm1407_vm12, %v774_v13, %v646_v42  ;;  %v345_v30 = vmul.f32 %v1397_v21, %v1381_v24  ;;  %v504_v59 = vadd.f32 0.041666646, %v488_v6 }
 0x10b   :  { %v711_v36 = vsel %vm1403_vm11, %v695_v12, %v631_v28  ;;  %v791_v19 = vsel %vm1411_vm13, %v775_v7, %v647_v44  ;;  %806 = vst [vmem:[#allocation2 + $0x40] sm:$0xff] %v710_v3  ;;  %822 = vst [vmem:[#allocation2 + $0xc0] sm:$0xff] %v790_v17  ;;  %v505_v29 = vadd.f32 0.041666646, %v489_v16  ;;  %v664_v25 = vand.u32 2, %v871_v14 }
 0x10c   :  { %807 = vst [vmem:[#allocation2 + $0x48] sm:$0xff] %v711_v36  ;;  %823 = vst [vmem:[#allocation2 + $0xc8] sm:$0xff] %v791_v19  ;;  %v665_v11 = vand.u32 2, %v873_v31  ;;  %v728_v23 = vadd.s32 1, %v871_v14  ;;  %v729_v26 = vadd.s32 1, %v873_v31  ;;  %v424_v32 = vmul.f32 %v408_v8, %v344_v20 }
 0x10d   :  { %v425_v33 = vmul.f32 %v409_v15, %v345_v30  ;;  %v520_v41 = vmul.f32 %v504_v59, %v1393_v40  ;;  %v521_v35 = vmul.f32 %v505_v29, %v1397_v21  ;;  %vm1447_vm14 = vcmp.eq.s32.totalorder %v600_v47, 1 }
 0x10e   :  { %vm1451_vm15 = vcmp.eq.s32.totalorder %v601_v48, 1  ;;  %v202_v50 = vadd.f32 0.5, %v1370_v61  ;;  %v203_v34 = vadd.f32 0.5, %v1373_v54  ;;  %v744_v14 = vand.u32 2, %v728_v23 }
 0x10f   :  { %v536_v49 = vadd.f32 -0.5, %v520_v41  ;;  %v537_v53 = vadd.f32 -0.5, %v521_v35  ;;  %v745_v31 = vand.u32 2, %v729_v26  ;;  %vm1457_vm0 = vcmp.eq.s32.totalorder %v664_v25, 2 }
 0x110   :  { %vm1461_vm1 = vcmp.eq.s32.totalorder %v665_v11, 2  ;;  %v218_v9 = vfloor.f32 %v202_v50  ;;  %v219_v18 = vfloor.f32 %v203_v34  ;;  %v440_v37 = vadd.f32 %v424_v32, %v1379_v22 }
 0x111   :  { %v441_v61 = vadd.f32 %v425_v33, %v1381_v24  ;;  %v552_v54 = vmul.f32 %v536_v49, %v1393_v40  ;;  %v553_v39 = vmul.f32 %v537_v53, %v1397_v21  ;;  %v156_v5 = vmul.f32 %v970_v55, %v140_v62 }
 0x112   :  { %v234_v43 = vmul.f32 1.5703125, %v218_v9  ;;  %v235_v1 = vmul.f32 1.5703125, %v219_v18  ;;  %v157_v10 = vmul.f32 %v972_v56, %v140_v62  ;;  %vm1471_vm2 = vcmp.eq.s32.totalorder %v744_v14, 2 }
 0x113   :  { %v568_v2 = vadd.f32 1.0, %v552_v54  ;;  %v569_v63 = vadd.f32 1.0, %v553_v39  ;;  %vm1475_vm3 = vcmp.eq.s32.totalorder %v745_v31, 2  ;;  %v266_v21 = vmul.f32 0.0004837513, %v218_v9 }
 0x114   :  { %v250_v24 = vsub.f32 %v1356_v27, %v234_v43  ;;  %v251_v40 = vsub.f32 %v1359_v0, %v235_v1  ;;  %v267_v47 = vmul.f32 0.0004837513, %v219_v18  ;;  %v298_v12 = vmul.f32 7.54979e-08, %v218_v9 }
 0x115   :  { %v632_v55 = vsel %vm1447_vm14, %v568_v2, %v440_v37  ;;  %v633_v56 = vsel %vm1451_vm15, %v569_v63, %v441_v61  ;;  %v648_v48 = vsel %vm1447_vm14, %v440_v37, %v568_v2  ;;  %v649_v58 = vsel %vm1451_vm15, %v441_v61, %v569_v63 }
 0x116   :  { %v696_v28 = vsub.f32 0.0, %v632_v55  ;;  %v697_v42 = vsub.f32 0.0, %v633_v56  ;;  %v776_v44 = vsub.f32 0.0, %v648_v48  ;;  %v777_v27 = vsub.f32 0.0, %v649_v58 }
 0x117   :  { %v282_v60 = vsub.f32 %v250_v24, %v266_v21  ;;  %v283_v0 = vsub.f32 %v251_v40, %v267_v47  ;;  %v299_v13 = vmul.f32 7.54979e-08, %v219_v18  ;;  %v874_v36 = vtrunc.f32 %v218_v9 }
 0x118   :  { %v712_v7 = vsel %vm1457_vm0, %v696_v28, %v632_v55  ;;  %v713_v8 = vsel %vm1461_vm1, %v697_v42, %v633_v56  ;;  %v792_v15 = vsel %vm1471_vm2, %v776_v44, %v648_v48  ;;  %v793_v6 = vsel %vm1475_vm3, %v777_v27, %v649_v58 }
 0x119   :  { %808 = vst [vmem:[#allocation2 + $0x50] sm:$0xff] %v712_v7  ;;  %809 = vst [vmem:[#allocation2 + $0x58] sm:$0xff] %v713_v8  ;;  %v314_v16 = vsub.f32 %v282_v60, %v298_v12  ;;  %v1497_v3 = vsub.f32 %v283_v0, %v299_v13  ;;  %v876_v17 = vtrunc.f32 %v219_v18  ;;  %v172_v30 = vadd.f32 %v156_v5, %v962_v51 }
 0x11a   :  { %824 = vst [vmem:[#allocation2 + $0xd0] sm:$0xff] %v792_v15  ;;  %825 = vst [vmem:[#allocation2 + $0xd8] sm:$0xff] %v793_v6  ;;  %v173_v59 = vadd.f32 %v157_v10, %v964_v52  ;;  %v875_v11 = vcvt.f32.s32 %v874_v36 }
 0x11b   :  { %v330_v19 = vmul.f32 %v314_v16, %v314_v16  ;;  %v331_v20 = vmul.f32 %v1497_v3, %v1497_v3  ;;  %v877_v32 = vcvt.f32.s32 %v876_v17  ;;  %v188_v35 = vmul.f32 0.63661975, %v172_v30 }
 0x11c   :  { %v189_v50 = vmul.f32 0.63661975, %v173_v59  ;;  %v602_v53 = vand.u32 1, %v875_v11  ;;  %v666_v9 = vand.u32 2, %v875_v11  ;;  %v730_v5 = vadd.s32 1, %v875_v11 }
 0x11d   :  { %v362_v29 = vmul.f32 -0.00019515296, %v330_v19  ;;  %v363_v25 = vmul.f32 -0.00019515296, %v331_v20  ;;  %v458_v23 = vmul.f32 2.4433157e-05, %v330_v19  ;;  %v346_v43 = vmul.f32 %v330_v19, %v314_v16 }
 0x11e   :  { %v459_v26 = vmul.f32 2.4433157e-05, %v331_v20  ;;  %v204_v14 = vadd.f32 0.5, %v188_v35  ;;  %v603_v62 = vand.u32 1, %v877_v32  ;;  %v205_v52 = vadd.f32 0.5, %v189_v50 }
 0x11f   :  { %v378_v33 = vadd.f32 0.008332161, %v362_v29  ;;  %v379_v41 = vadd.f32 0.008332161, %v363_v25  ;;  %v474_v4 = vadd.f32 -0.0013887316, %v458_v23  ;;  %v347_v1 = vmul.f32 %v331_v20, %v1497_v3 }
 0x120   :  { %v475_v38 = vadd.f32 -0.0013887316, %v459_v26  ;;  %v1503_v18 = vfloor.f32 %v204_v14  ;;  %v667_v54 = vand.u32 2, %v877_v32  ;;  %v1505_v39 = vfloor.f32 %v205_v52 }
 0x121   :  { %v394_v34 = vmul.f32 %v378_v33, %v330_v19  ;;  %v395_v49 = vmul.f32 %v379_v41, %v331_v20  ;;  %v490_v31 = vmul.f32 %v474_v4, %v330_v19  ;;  %v731_v57 = vadd.s32 1, %v877_v32 }
 0x122   :  { %v491_v51 = vmul.f32 %v475_v38, %v331_v20  ;;  %v236_v10 = vmul.f32 1.5703125, %v1503_v18  ;;  %v237_v22 = vmul.f32 1.5703125, %v1505_v39  ;;  %v268_v47 = vmul.f32 0.0004837513, %v1503_v18 }
 0x123   :  { %v410_v46 = vadd.f32 -0.16666655, %v394_v34  ;;  %v411_v45 = vadd.f32 -0.16666655, %v395_v49  ;;  %v506_v37 = vadd.f32 0.041666646, %v490_v31 }
 0x124   :  { %v507_v61 = vadd.f32 0.041666646, %v491_v51  ;;  %v252_v21 = vsub.f32 %v172_v30, %v236_v10  ;;  %v253_v48 = vsub.f32 %v173_v59, %v237_v22  ;;  %v269_v58 = vmul.f32 0.0004837513, %v1505_v39 }
 0x125   :  { %v522_v2 = vmul.f32 %v506_v37, %v330_v19  ;;  %v426_v24 = vmul.f32 %v410_v46, %v346_v43  ;;  %v427_v40 = vmul.f32 %v411_v45, %v347_v1  ;;  %vm1512_vm4 = vcmp.eq.s32.totalorder %v602_v53, 1 }
 0x126   :  { %v523_v63 = vmul.f32 %v507_v61, %v331_v20  ;;  %v746_v42 = vand.u32 2, %v730_v5  ;;  %v284_v44 = vsub.f32 %v252_v21, %v268_v47  ;;  %v300_v27 = vmul.f32 7.54979e-08, %v1503_v18 }
 0x127   :  { %v538_v55 = vadd.f32 -0.5, %v522_v2  ;;  %v285_v12 = vsub.f32 %v253_v48, %v269_v58  ;;  %v301_v13 = vmul.f32 7.54979e-08, %v1505_v39  ;;  %v442_v7 = vadd.f32 %v426_v24, %v314_v16 }
 0x128   :  { %v539_v56 = vadd.f32 -0.5, %v523_v63  ;;  %vm619_vm5 = vcmp.eq.s32.totalorder %v603_v62, 1  ;;  %v747_v8 = vand.u32 2, %v731_v57  ;;  %v316_v15 = vsub.f32 %v284_v44, %v300_v27 }
 0x129   :  { %v554_v60 = vmul.f32 %v538_v55, %v330_v19  ;;  %v443_v6 = vadd.f32 %v427_v40, %v1497_v3  ;;  %v317_v30 = vsub.f32 %v285_v12, %v301_v13  ;;  %vm1519_vm6 = vcmp.eq.s32.totalorder %v666_v9, 2 }
 0x12a   :  { %v555_v0 = vmul.f32 %v539_v56, %v331_v20  ;;  %vm1523_vm7 = vcmp.eq.s32.totalorder %v667_v54, 2  ;;  %vm1527_vm8 = vcmp.eq.s32.totalorder %v746_v42, 2  ;;  %v332_v16 = vmul.f32 %v316_v15, %v316_v15 }
 0x12b   :  { %v570_v36 = vadd.f32 1.0, %v554_v60  ;;  %vm763_vm9 = vcmp.eq.s32.totalorder %v747_v8, 2  ;;  %v333_v41 = vmul.f32 %v317_v30, %v317_v30  ;;  %v878_v62 = vtrunc.f32 %v1503_v18 }
 0x12c   :  { %v571_v17 = vadd.f32 1.0, %v555_v0  ;;  %v364_v35 = vmul.f32 -0.00019515296, %v332_v16  ;;  %v460_v4 = vmul.f32 2.4433157e-05, %v332_v16  ;;  %v880_v9 = vtrunc.f32 %v1505_v39 }
 0x12d   :  { %v634_v20 = vsel %vm1512_vm4, %v570_v36, %v442_v7  ;;  %v650_v25 = vsel %vm1512_vm4, %v442_v7, %v570_v36  ;;  %v365_v53 = vmul.f32 -0.00019515296, %v333_v41  ;;  %v461_v31 = vmul.f32 2.4433157e-05, %v333_v41 }
 0x12e   :  { %v635_v3 = vsel %vm619_vm5, %v571_v17, %v443_v6  ;;  %v651_v11 = vsel %vm619_vm5, %v443_v6, %v571_v17  ;;  %v698_v23 = vsub.f32 0.0, %v634_v20  ;;  %v778_v32 = vsub.f32 0.0, %v650_v25 }
 0x12f   :  { %v699_v26 = vsub.f32 0.0, %v635_v3  ;;  %v779_v33 = vsub.f32 0.0, %v651_v11  ;;  %v380_v14 = vadd.f32 0.008332161, %v364_v35  ;;  %v476_v51 = vadd.f32 -0.0013887316, %v460_v4 }
 0x130   :  { %v714_v38 = vsel %vm1519_vm6, %v698_v23, %v634_v20  ;;  %v794_v34 = vsel %vm1527_vm8, %v778_v32, %v650_v25  ;;  %v381_v52 = vadd.f32 0.008332161, %v365_v53  ;;  %v477_v45 = vadd.f32 -0.0013887316, %v461_v31 }
 0x131   :  { %v715_v50 = vsel %vm1523_vm7, %v699_v26, %v635_v3  ;;  %v795_v49 = vsel %vm763_vm9, %v779_v33, %v651_v11  ;;  %810 = vst [vmem:[#allocation2 + $0x60] sm:$0xff] %v714_v38  ;;  %826 = vst [vmem:[#allocation2 + $0xe0] sm:$0xff] %v794_v34  ;;  %v396_v46 = vmul.f32 %v380_v14, %v332_v16  ;;  %v879_v5 = vcvt.f32.s32 %v878_v62 }
 0x132   :  { %811 = vst [vmem:[#allocation2 + $0x68] sm:$0xff] %v715_v50  ;;  %827 = vst [vmem:[#allocation2 + $0xe8] sm:$0xff] %v795_v49  ;;  %v492_v37 = vmul.f32 %v476_v51, %v332_v16  ;;  %v397_v61 = vmul.f32 %v381_v52, %v333_v41  ;;  %v493_v54 = vmul.f32 %v477_v45, %v333_v41  ;;  %v881_v63 = vcvt.f32.s32 %v880_v9 }
 0x133   :  { %v412_v43 = vadd.f32 -0.16666655, %v396_v46  ;;  %v348_v57 = vmul.f32 %v332_v16, %v316_v15  ;;  %v349_v24 = vmul.f32 %v333_v41, %v317_v30  ;;  %v604_v47 = vand.u32 1, %v879_v5 }
 0x134   :  { %v508_v1 = vadd.f32 0.041666646, %v492_v37  ;;  %v413_v10 = vadd.f32 -0.16666655, %v397_v61  ;;  %v509_v2 = vadd.f32 0.041666646, %v493_v54 }
 0x135   :  { %v428_v21 = vmul.f32 %v412_v43, %v348_v57  ;;  %v732_v55 = vadd.s32 1, %v879_v5  ;;  %v733_v39 = vadd.s32 1, %v881_v63  ;;  %v605_v28 = vand.u32 1, %v881_v63 }
 0x136   :  { %v524_v22 = vmul.f32 %v508_v1, %v332_v16  ;;  %v525_v40 = vmul.f32 %v509_v2, %v333_v41  ;;  %v429_v56 = vmul.f32 %v413_v10, %v349_v24  ;;  %v668_v44 = vand.u32 2, %v879_v5 }
 0x137   :  { %v444_v27 = vadd.f32 %v428_v21, %v316_v15  ;;  %vm620_vm10 = vcmp.eq.s32.totalorder %v604_v47, 1  ;;  %v748_v0 = vand.u32 2, %v732_v55  ;;  %v669_v7 = vand.u32 2, %v881_v63 }
 0x138   :  { %v540_v18 = vadd.f32 -0.5, %v524_v22  ;;  %v541_v48 = vadd.f32 -0.5, %v525_v40  ;;  %v445_v12 = vadd.f32 %v429_v56, %v317_v30  ;;  %v749_v8 = vand.u32 2, %v733_v39 }
 0x139   :  { %vm621_vm11 = vcmp.eq.s32.totalorder %v605_v28, 1  ;;  %vm684_vm12 = vcmp.eq.s32.totalorder %v668_v44, 2  ;;  %vm764_vm13 = vcmp.eq.s32.totalorder %v748_v0, 2  ;;  %vm685_vm14 = vcmp.eq.s32.totalorder %v669_v7, 2 }
 0x13a   :  { %v556_v58 = vmul.f32 %v540_v18, %v332_v16  ;;  %v557_v42 = vmul.f32 %v541_v48, %v333_v41  ;;  %vm765_vm15 = vcmp.eq.s32.totalorder %v749_v8, 2 }
 0x13c   :  { %v572_v60 = vadd.f32 1.0, %v556_v58  ;;  %v573_v13 = vadd.f32 1.0, %v557_v42 }
 0x13e   :  { %v636_v6 = vsel %vm620_vm10, %v572_v60, %v444_v27  ;;  %v652_v36 = vsel %vm620_vm10, %v444_v27, %v572_v60  ;;  %v637_v17 = vsel %vm621_vm11, %v573_v13, %v445_v12  ;;  %v653_v59 = vsel %vm621_vm11, %v445_v12, %v573_v13 }
 0x13f   :  { %v700_v29 = vsub.f32 0.0, %v636_v6  ;;  %v780_v19 = vsub.f32 0.0, %v652_v36  ;;  %v701_v16 = vsub.f32 0.0, %v637_v17  ;;  %v781_v15 = vsub.f32 0.0, %v653_v59 }
 0x141   :  { %v716_v20 = vsel %vm684_vm12, %v700_v29, %v636_v6  ;;  %v796_v30 = vsel %vm764_vm13, %v780_v19, %v652_v36  ;;  %v717_v3 = vsel %vm685_vm14, %v701_v16, %v637_v17  ;;  %v797_v25 = vsel %vm765_vm15, %v781_v15, %v653_v59 }
 0x142   :  { %812 = vst [vmem:[#allocation2 + $0x70] sm:$0xff] %v716_v20  ;;  %828 = vst [vmem:[#allocation2 + $0xf0] sm:$0xff] %v796_v30 }
 0x143   :  { %813 = vst [vmem:[#allocation2 + $0x78] sm:$0xff] %v717_v3  ;;  %829 = vst [vmem:[#allocation2 + $0xf8] sm:$0xff] %v797_v25 }
 0x144   :  { %902 = shalt.err (!%p899_p4)
}
 0x145   :  { %s903_s26 = scalar_lea.hbm %s1556_s1, 4096 }
 0x146   :  { %p904_p5 = scmp.ne.s32.totalorder %s1556_s1, %s903_s26  ;;  %p907_p6 = scmp.lt.u32.totalorder %s903_s26, %s1556_s1 }
 0x148   :  { %p909_p7 = pnand %p907_p6, %p904_p5 }
 0x14a   :  { %912 = shalt.err (!%p909_p7)
}
 0x14b   :  { %s918_s2 = smov 256   ;;  %s919_s3 = smov 16  }
 0x14c   :  { %841 = dma.vmem_to_hbm [thread:$0]  %s836_s22, 4096, %s1556_s1, [#allocation3], %s918_s2, %s918_s2, %s919_s3  }
 0x14d   :  { %913 = dma.done.wait [#allocation3], 4096  }
 0x14e   :  { %914 = vsyncadd [#allocation3], 4294963200 }
 0x14f   :  { %845 = vsyncpa [#allocation3], 1 }

</bundles_post_ra>
